<compile_context>
chip_gen: v7x
topology: tpu7x:2x2x1
jax: 0.10.0
libtpu: 0.0.40
codegen_flags: <defaults>
</compile_context>

<pallas_src>
import functools

import jax
import jax.numpy as jnp
from jax.experimental import pallas as pl
from jax.experimental.pallas import tpu as pltpu


# ----------------------------- Pallas kernel --------------------------------
def _gat_fused_kernel(*refs, layer_meta, negative_slope):
    """Full GAT forward in one kernel invocation (everything resident in VMEM).

    refs = (x, adj, Wpk_0, ..., Wpk_{L-1}, out)
      x    : (N, F_in0)              bfloat16 node features
      adj  : (N, N)                  int8, adj[i, j] = 1 iff edge j(src) -> i(dst)
      Wpk_l: (F_in_l, H_l*F_out_l + 2*H_l)  bfloat16 packed weights:
             [:, :H*F_out]            head-packed projection W (heads on lanes)
             [:, H*F_out : H*F_out+H] W_h @ attn_l_h  (source term)
             [:, H*F_out+H : ]        W_h @ attn_r_h  (dest term)
      out  : (N, num_classes)        float32 logits
    layer_meta: tuple of (num_heads, f_out, is_last) per layer (static).
    """
    x_ref, adj_ref = refs[0], refs[1]
    out_ref = refs[-1]
    w_refs = refs[2:-1]

    # int8 adjacency -> boolean mask; the only (N, N) array held across layers.
    # Convert i8 -> f32 before the compare so the mask layout matches the f32
    # selects downstream (no packed-mask relayouts in the hot loop).
    adj_mask = adj_ref[...].astype(jnp.float32) > 0.0

    h = x_ref[...]                        # (N, F_in) bf16 layer input

    for l, (num_heads, f_out, is_last) in enumerate(layer_meta):
        wpk = w_refs[l][...]              # (F_in, H*F_out + 2H) bf16
        hf = num_heads * f_out

        # Single packed MXU matmul per layer: projection + both attention matvecs.
        proj = jnp.dot(h, wpk, preferred_element_type=jnp.float32)
        feat = proj[:, :hf]                               # (N, H*F_out) f32
        el = proj[:, hf:hf + num_heads]                   # (N, H) source term
        er = proj[:, hf + num_heads:hf + 2 * num_heads]   # (N, H) dest term

        feat_bf = feat.astype(jnp.bfloat16)               # MXU RHS for aggregation
        el_t = el.T                                       # (H, N): one relayout/layer

        head_outs = []
        acc = None
        for hh in range(num_heads):
            # e[i, j] = er_i + el_j   (edge j -> i), then leaky relu.
            e = er[:, hh:hh + 1] + el_t[hh:hh + 1, :]     # (N, N)
            e = jnp.where(e >= 0, e, negative_slope * e)

            # Edge softmax numerator over in-neighbors.  Pre-max -1e30 masking
            # is dropped: softmax is shift-invariant, the unmasked row max still
            # keeps exp(e - m) <= 1, and the post-exp select zeroes non-edges.
            m = jnp.max(e, axis=-1, keepdims=True)
            p = jnp.where(adj_mask, jnp.exp(e - m), 0.0)  # (N, N) unnormalized
            denom = jnp.maximum(jnp.sum(p, axis=-1, keepdims=True), 1e-30)

            # Aggregate UNNORMALIZED messages on the MXU, then normalize the
            # small (N, F_out) result (saves an (N, N) VPU multiply per head).
            oh = jnp.dot(p.astype(jnp.bfloat16),
                         feat_bf[:, hh * f_out:(hh + 1) * f_out],
                         preferred_element_type=jnp.float32)

            if is_last:
                # Output layer: exact reciprocal, with the head-mean 1/H folded
                # into the same (N, 1) scale; accumulate the head mean directly.
                acc_h = oh * ((1.0 / num_heads) / denom)
                acc = acc_h if acc is None else acc + acc_h
            else:
                head_outs.append(oh * pl.reciprocal(denom, approx=True))

        if is_last:
            out_ref[...] = acc                            # .mean(1) over heads
        else:
            # flatten(1): concat heads once into a single lane block so the next
            # layer runs ONE deep-K matmul instead of H shallow split-K matmuls.
            h_cat = jnp.concatenate(head_outs, axis=-1)   # (N, H*F_out) f32
            h_act = jnp.where(h_cat > 0, h_cat, jnp.exp(h_cat) - 1.0)   # ELU
            h = h_act.astype(jnp.bfloat16)                # bf16 MXU input next layer


# ------------------------------ wrapper --------------------------------------
def _pack_layer(W, attn_l, attn_r):
    """W: (H, F_in, F_out), attn_*: (H, F_out) ->
       one packed bf16 matrix (F_in, H*F_out + 2H) = [Wp | W@a_l | W@a_r]."""
    H, F_in, F_out = W.shape
    Wp = jnp.transpose(W, (1, 0, 2)).reshape(F_in, H * F_out)
    Wal = jnp.einsum("hif,hf->ih", W, attn_l)             # (F_in, H) source fold
    War = jnp.einsum("hif,hf->ih", W, attn_r)             # (F_in, H) dest fold
    return jnp.concatenate([Wp, Wal, War], axis=1).astype(jnp.bfloat16)


def gat_forward(x, params, adj, *, negative_slope=0.2):
    """params: list of (W, attn_l, attn_r); hidden layers use ELU + head-concat
    (flatten(1)); the last layer averages heads. Returns logits (N, C) f32."""
    N = x.shape[0]
    num_classes = params[-1][0].shape[2]
    layer_meta = tuple(
        (int(W.shape[0]), int(W.shape[2]), l == len(params) - 1)
        for l, (W, _, _) in enumerate(params))

    packed_weights = [_pack_layer(W, al, ar) for (W, al, ar) in params]

    # bf16 features/weights (MXU-native), int8 adjacency (4x smaller DMA/VMEM).
    inputs = ([x.astype(jnp.bfloat16), (adj > 0).astype(jnp.int8)]
              + packed_weights)

    kernel = functools.partial(_gat_fused_kernel,
                               layer_meta=layer_meta,
                               negative_slope=negative_slope)

    return pl.pallas_call(
        kernel,
        out_shape=jax.ShapeDtypeStruct((N, num_classes), jnp.float32),
        in_specs=[pl.BlockSpec(memory_space=pltpu.MemorySpace.VMEM)
                  for _ in inputs],
        out_specs=pl.BlockSpec(memory_space=pltpu.MemorySpace.VMEM),
        # Explicit scoped-VMEM budget with ample headroom for the resident
        # working set at this toy N (re-derive together with a row-tiled grid
        # before scaling N, especially on v7x's 64 MiB physical VMEM).
        compiler_params=pltpu.CompilerParams(vmem_limit_bytes=32 * 1024 * 1024),
    )(*inputs)


# -------------------------- pure-JAX reference --------------------------------
def _ref_conv(h, W, al, ar, adj, negative_slope, apply_elu):
    H = W.shape[0]
    outs = []
    for hh in range(H):
        feat = h @ W[hh]
        el = jnp.sum(feat * al[hh][None, :], axis=-1, keepdims=True)
        er = jnp.sum(feat * ar[hh][None, :], axis=-1, keepdims=True)
        e = er + el.T
        e = jnp.where(e >= 0, e, negative_slope * e)
        e = jnp.where(adj > 0, e, -1e30)
        p = jnp.exp(e - jnp.max(e, axis=-1, keepdims=True)) * adj
        alpha = p / jnp.sum(p, axis=-1, keepdims=True)
        o = alpha @ feat
        if apply_elu:
            o = jnp.where(o > 0, o, jnp.exp(o) - 1.0)
        outs.append(o)
    return jnp.stack(outs, axis=0)


def gat_forward_ref(x, params, adj, *, negative_slope=0.2):
    h = x
    for (W, al, ar) in params[:-1]:
        out = _ref_conv(h, W, al, ar, adj, negative_slope, True)
        Hh, N, F = out.shape
        h = jnp.transpose(out, (1, 0, 2)).reshape(N, Hh * F)
    W, al, ar = params[-1]
    out = _ref_conv(h, W, al, ar, adj, negative_slope, False)
    return jnp.mean(out, axis=0)


# ---------------------------------- main --------------------------------------
if __name__ == "__main__":
    # Small deterministic config consistent with the module's __init__:
    #   num_layers=2, in_dim=16, num_hidden=16, num_classes=8, heads=[2,2,2]
    #   feat_drop=attn_drop=0, negative_slope=0.2, residual=False, activation=ELU
    N = 16
    num_layers = 2
    in_dim = 16
    num_hidden = 16
    num_classes = 8
    heads = [2, 2, 2]
    negative_slope = 0.2

    key = jax.random.PRNGKey(0)

    # Deterministic graph: random sparse edges + self loops (no 0-degree rows).
    key, k_adj = jax.random.split(key)
    adj = (jax.random.uniform(k_adj, (N, N)) < 0.3).astype(jnp.float32)
    adj = jnp.maximum(adj, jnp.eye(N, dtype=jnp.float32))

    # Deterministic GATConv parameters (W: (H, F_in, F_out), attn_l/r: (H, F_out)).
    def make_layer(k, f_in, f_out, n_heads):
        k1, k2, k3 = jax.random.split(k, 3)
        scale = 1.0 / jnp.sqrt(jnp.float32(f_in))
        W = jax.random.normal(k1, (n_heads, f_in, f_out), jnp.float32) * scale
        al = jax.random.normal(k2, (n_heads, f_out), jnp.float32) * 0.1
        ar = jax.random.normal(k3, (n_heads, f_out), jnp.float32) * 0.1
        return W, al, ar

    params = []
    key, k0 = jax.random.split(key)
    params.append(make_layer(k0, in_dim, num_hidden, heads[0]))
    for l in range(1, num_layers):
        key, kl = jax.random.split(key)
        params.append(make_layer(kl, num_hidden * heads[l - 1], num_hidden, heads[l]))
    key, kl = jax.random.split(key)
    params.append(make_layer(kl, num_hidden * heads[-2], num_classes, heads[-1]))

    # Input node features.
    key, kx = jax.random.split(key)
    x = jax.random.normal(kx, (N, in_dim), jnp.float32)

    logits = gat_forward(x, params, adj, negative_slope=negative_slope)
    logits = jax.block_until_ready(logits)

    ref = gat_forward_ref(x, params, adj, negative_slope=negative_slope)
    assert logits.shape == (N, num_classes)
    # Tolerance accounts for bf16 MXU inputs (f32 accumulation) across 3 layers
    # plus the EUP approx reciprocal in the hidden-layer edge softmax; semantic
    # bugs would produce O(0.1-1) discrepancies, well above this bound.
    assert jnp.max(jnp.abs(logits - ref)) < 5e-2, "mismatch vs reference"

    print("KERNEL_OK")
</pallas_src>

<mosaic_0001>
module attributes {stable_mosaic.version = 11 : i64} {
  func.func @_gat_fused_kernel(%arg0: memref<16x16xbf16, #tpu.memory_space<vmem>>, %arg1: memref<16x16xi8, #tpu.memory_space<vmem>>, %arg2: memref<16x36xbf16, #tpu.memory_space<vmem>>, %arg3: memref<32x36xbf16, #tpu.memory_space<vmem>>, %arg4: memref<32x20xbf16, #tpu.memory_space<vmem>>, %arg5: memref<16x8xf32, #tpu.memory_space<vmem>>) attributes {dimension_semantics = [], scalar_prefetch = 0 : i64, scratch_operands = 0 : i64, tpu.core_type = #tpu.core_type<tc>} {
    %c0 = arith.constant 0 : index
    %c0_0 = arith.constant 0 : index
    %0 = vector.load %arg1[%c0, %c0_0] : memref<16x16xi8, #tpu.memory_space<vmem>>, vector<16x16xi8>
    %1 = arith.sitofp %0 : vector<16x16xi8> to vector<16x16xf32>
    %cst = arith.constant 0.000000e+00 : f32
    %2 = vector.broadcast %cst : f32 to vector<16x16xf32>
    %3 = arith.cmpf ogt, %1, %2 : vector<16x16xf32>
    %c0_1 = arith.constant 0 : index
    %c0_2 = arith.constant 0 : index
    %4 = vector.load %arg0[%c0_1, %c0_2] : memref<16x16xbf16, #tpu.memory_space<vmem>>, vector<16x16xbf16>
    %c0_3 = arith.constant 0 : index
    %c0_4 = arith.constant 0 : index
    %5 = vector.load %arg2[%c0_3, %c0_4] : memref<16x36xbf16, #tpu.memory_space<vmem>>, vector<16x36xbf16>
    %cst_5 = arith.constant dense<0.000000e+00> : vector<16x36xf32>
    %6 = tpu.matmul %4, %5, %cst_5 {dimension_numbers = #tpu.dot_dimension_numbers<[1], [0], [0], [1], [0, 0, 1, 1], [], []>} : vector<16x16xbf16>, vector<16x36xbf16>, vector<16x36xf32> -> vector<16x36xf32>
    %7 = vector.extract_strided_slice %6 {offsets = [0, 0], sizes = [16, 32], strides = [1, 1]} : vector<16x36xf32> to vector<16x32xf32>
    %8 = vector.extract_strided_slice %6 {offsets = [0, 32], sizes = [16, 2], strides = [1, 1]} : vector<16x36xf32> to vector<16x2xf32>
    %9 = vector.extract_strided_slice %6 {offsets = [0, 34], sizes = [16, 2], strides = [1, 1]} : vector<16x36xf32> to vector<16x2xf32>
    %10 = arith.truncf %7 : vector<16x32xf32> to vector<16x32xbf16>
    %11 = tpu.transpose %8, [1, 0] : vector<16x2xf32> -> vector<2x16xf32>
    %12 = vector.extract_strided_slice %9 {offsets = [0, 0], sizes = [16, 1], strides = [1, 1]} : vector<16x2xf32> to vector<16x1xf32>
    %13 = vector.extract_strided_slice %11 {offsets = [0, 0], sizes = [1, 16], strides = [1, 1]} : vector<2x16xf32> to vector<1x16xf32>
    %14 = vector.broadcast %12 : vector<16x1xf32> to vector<16x16xf32>
    %15 = vector.broadcast %13 : vector<1x16xf32> to vector<16x16xf32>
    %16 = arith.addf %14, %15 : vector<16x16xf32>
    %cst_6 = arith.constant 0.000000e+00 : f32
    %17 = vector.broadcast %cst_6 : f32 to vector<16x16xf32>
    %18 = arith.cmpf oge, %16, %17 : vector<16x16xf32>
    %cst_7 = arith.constant 2.000000e-01 : f32
    %19 = vector.broadcast %cst_7 : f32 to vector<16x16xf32>
    %20 = arith.mulf %19, %16 : vector<16x16xf32>
    %21 = arith.select %18, %16, %20 : vector<16x16xi1>, vector<16x16xf32>
    %cst_8 = arith.constant dense<0xFF800000> : vector<16xf32>
    %22 = vector.multi_reduction <maximumf>, %21, %cst_8 [1] : vector<16x16xf32> to vector<16xf32>
    %23 = vector.shape_cast %22 : vector<16xf32> to vector<16x1xf32>
    %24 = vector.broadcast %23 : vector<16x1xf32> to vector<16x16xf32>
    %25 = arith.subf %21, %24 : vector<16x16xf32>
    %26 = math.exp %25 : vector<16x16xf32>
    %cst_9 = arith.constant 0.000000e+00 : f32
    %27 = vector.broadcast %cst_9 : f32 to vector<16x16xf32>
    %28 = arith.select %3, %26, %27 : vector<16x16xi1>, vector<16x16xf32>
    %cst_10 = arith.constant dense<0.000000e+00> : vector<16xf32>
    %29 = vector.multi_reduction <add>, %28, %cst_10 [1] : vector<16x16xf32> to vector<16xf32>
    %30 = vector.shape_cast %29 : vector<16xf32> to vector<16x1xf32>
    %cst_11 = arith.constant 1.000000e-30 : f32
    %31 = vector.broadcast %cst_11 : f32 to vector<16x1xf32>
    %32 = arith.maximumf %30, %31 : vector<16x1xf32>
    %33 = arith.truncf %28 : vector<16x16xf32> to vector<16x16xbf16>
    %34 = vector.extract_strided_slice %10 {offsets = [0, 0], sizes = [16, 16], strides = [1, 1]} : vector<16x32xbf16> to vector<16x16xbf16>
    %cst_12 = arith.constant dense<0.000000e+00> : vector<16x16xf32>
    %35 = tpu.matmul %33, %34, %cst_12 {dimension_numbers = #tpu.dot_dimension_numbers<[1], [0], [0], [1], [0, 0, 1, 1], [], []>} : vector<16x16xbf16>, vector<16x16xbf16>, vector<16x16xf32> -> vector<16x16xf32>
    %36 = tpu.reciprocal %32 {approx = true} : vector<16x1xf32> -> vector<16x1xf32>
    %37 = vector.broadcast %36 : vector<16x1xf32> to vector<16x16xf32>
    %38 = arith.mulf %35, %37 : vector<16x16xf32>
    %39 = vector.extract_strided_slice %9 {offsets = [0, 1], sizes = [16, 1], strides = [1, 1]} : vector<16x2xf32> to vector<16x1xf32>
    %40 = vector.extract_strided_slice %11 {offsets = [1, 0], sizes = [1, 16], strides = [1, 1]} : vector<2x16xf32> to vector<1x16xf32>
    %41 = vector.broadcast %39 : vector<16x1xf32> to vector<16x16xf32>
    %42 = vector.broadcast %40 : vector<1x16xf32> to vector<16x16xf32>
    %43 = arith.addf %41, %42 : vector<16x16xf32>
    %cst_13 = arith.constant 0.000000e+00 : f32
    %44 = vector.broadcast %cst_13 : f32 to vector<16x16xf32>
    %45 = arith.cmpf oge, %43, %44 : vector<16x16xf32>
    %cst_14 = arith.constant 2.000000e-01 : f32
    %46 = vector.broadcast %cst_14 : f32 to vector<16x16xf32>
    %47 = arith.mulf %46, %43 : vector<16x16xf32>
    %48 = arith.select %45, %43, %47 : vector<16x16xi1>, vector<16x16xf32>
    %cst_15 = arith.constant dense<0xFF800000> : vector<16xf32>
    %49 = vector.multi_reduction <maximumf>, %48, %cst_15 [1] : vector<16x16xf32> to vector<16xf32>
    %50 = vector.shape_cast %49 : vector<16xf32> to vector<16x1xf32>
    %51 = vector.broadcast %50 : vector<16x1xf32> to vector<16x16xf32>
    %52 = arith.subf %48, %51 : vector<16x16xf32>
    %53 = math.exp %52 : vector<16x16xf32>
    %cst_16 = arith.constant 0.000000e+00 : f32
    %54 = vector.broadcast %cst_16 : f32 to vector<16x16xf32>
    %55 = arith.select %3, %53, %54 : vector<16x16xi1>, vector<16x16xf32>
    %cst_17 = arith.constant dense<0.000000e+00> : vector<16xf32>
    %56 = vector.multi_reduction <add>, %55, %cst_17 [1] : vector<16x16xf32> to vector<16xf32>
    %57 = vector.shape_cast %56 : vector<16xf32> to vector<16x1xf32>
    %cst_18 = arith.constant 1.000000e-30 : f32
    %58 = vector.broadcast %cst_18 : f32 to vector<16x1xf32>
    %59 = arith.maximumf %57, %58 : vector<16x1xf32>
    %60 = arith.truncf %55 : vector<16x16xf32> to vector<16x16xbf16>
    %61 = vector.extract_strided_slice %10 {offsets = [0, 16], sizes = [16, 16], strides = [1, 1]} : vector<16x32xbf16> to vector<16x16xbf16>
    %cst_19 = arith.constant dense<0.000000e+00> : vector<16x16xf32>
    %62 = tpu.matmul %60, %61, %cst_19 {dimension_numbers = #tpu.dot_dimension_numbers<[1], [0], [0], [1], [0, 0, 1, 1], [], []>} : vector<16x16xbf16>, vector<16x16xbf16>, vector<16x16xf32> -> vector<16x16xf32>
    %63 = tpu.reciprocal %59 {approx = true} : vector<16x1xf32> -> vector<16x1xf32>
    %64 = vector.broadcast %63 : vector<16x1xf32> to vector<16x16xf32>
    %65 = arith.mulf %62, %64 : vector<16x16xf32>
    %66 = tpu.concatenate %38, %65 in 1 : vector<16x16xf32>, vector<16x16xf32> -> vector<16x32xf32>
    %cst_20 = arith.constant 0.000000e+00 : f32
    %67 = vector.broadcast %cst_20 : f32 to vector<16x32xf32>
    %68 = arith.cmpf ogt, %66, %67 : vector<16x32xf32>
    %69 = math.exp %66 : vector<16x32xf32>
    %cst_21 = arith.constant 1.000000e+00 : f32
    %70 = vector.broadcast %cst_21 : f32 to vector<16x32xf32>
    %71 = arith.subf %69, %70 : vector<16x32xf32>
    %72 = arith.select %68, %66, %71 : vector<16x32xi1>, vector<16x32xf32>
    %73 = arith.truncf %72 : vector<16x32xf32> to vector<16x32xbf16>
    %c0_22 = arith.constant 0 : index
    %c0_23 = arith.constant 0 : index
    %74 = vector.load %arg3[%c0_22, %c0_23] : memref<32x36xbf16, #tpu.memory_space<vmem>>, vector<32x36xbf16>
    %cst_24 = arith.constant dense<0.000000e+00> : vector<16x36xf32>
    %75 = tpu.matmul %73, %74, %cst_24 {dimension_numbers = #tpu.dot_dimension_numbers<[1], [0], [0], [1], [0, 0, 1, 1], [], []>} : vector<16x32xbf16>, vector<32x36xbf16>, vector<16x36xf32> -> vector<16x36xf32>
    %76 = vector.extract_strided_slice %75 {offsets = [0, 0], sizes = [16, 32], strides = [1, 1]} : vector<16x36xf32> to vector<16x32xf32>
    %77 = vector.extract_strided_slice %75 {offsets = [0, 32], sizes = [16, 2], strides = [1, 1]} : vector<16x36xf32> to vector<16x2xf32>
    %78 = vector.extract_strided_slice %75 {offsets = [0, 34], sizes = [16, 2], strides = [1, 1]} : vector<16x36xf32> to vector<16x2xf32>
    %79 = arith.truncf %76 : vector<16x32xf32> to vector<16x32xbf16>
    %80 = tpu.transpose %77, [1, 0] : vector<16x2xf32> -> vector<2x16xf32>
    %81 = vector.extract_strided_slice %78 {offsets = [0, 0], sizes = [16, 1], strides = [1, 1]} : vector<16x2xf32> to vector<16x1xf32>
    %82 = vector.extract_strided_slice %80 {offsets = [0, 0], sizes = [1, 16], strides = [1, 1]} : vector<2x16xf32> to vector<1x16xf32>
    %83 = vector.broadcast %81 : vector<16x1xf32> to vector<16x16xf32>
    %84 = vector.broadcast %82 : vector<1x16xf32> to vector<16x16xf32>
    %85 = arith.addf %83, %84 : vector<16x16xf32>
    %cst_25 = arith.constant 0.000000e+00 : f32
    %86 = vector.broadcast %cst_25 : f32 to vector<16x16xf32>
    %87 = arith.cmpf oge, %85, %86 : vector<16x16xf32>
    %cst_26 = arith.constant 2.000000e-01 : f32
    %88 = vector.broadcast %cst_26 : f32 to vector<16x16xf32>
    %89 = arith.mulf %88, %85 : vector<16x16xf32>
    %90 = arith.select %87, %85, %89 : vector<16x16xi1>, vector<16x16xf32>
    %cst_27 = arith.constant dense<0xFF800000> : vector<16xf32>
    %91 = vector.multi_reduction <maximumf>, %90, %cst_27 [1] : vector<16x16xf32> to vector<16xf32>
    %92 = vector.shape_cast %91 : vector<16xf32> to vector<16x1xf32>
    %93 = vector.broadcast %92 : vector<16x1xf32> to vector<16x16xf32>
    %94 = arith.subf %90, %93 : vector<16x16xf32>
    %95 = math.exp %94 : vector<16x16xf32>
    %cst_28 = arith.constant 0.000000e+00 : f32
    %96 = vector.broadcast %cst_28 : f32 to vector<16x16xf32>
    %97 = arith.select %3, %95, %96 : vector<16x16xi1>, vector<16x16xf32>
    %cst_29 = arith.constant dense<0.000000e+00> : vector<16xf32>
    %98 = vector.multi_reduction <add>, %97, %cst_29 [1] : vector<16x16xf32> to vector<16xf32>
    %99 = vector.shape_cast %98 : vector<16xf32> to vector<16x1xf32>
    %cst_30 = arith.constant 1.000000e-30 : f32
    %100 = vector.broadcast %cst_30 : f32 to vector<16x1xf32>
    %101 = arith.maximumf %99, %100 : vector<16x1xf32>
    %102 = arith.truncf %97 : vector<16x16xf32> to vector<16x16xbf16>
    %103 = vector.extract_strided_slice %79 {offsets = [0, 0], sizes = [16, 16], strides = [1, 1]} : vector<16x32xbf16> to vector<16x16xbf16>
    %cst_31 = arith.constant dense<0.000000e+00> : vector<16x16xf32>
    %104 = tpu.matmul %102, %103, %cst_31 {dimension_numbers = #tpu.dot_dimension_numbers<[1], [0], [0], [1], [0, 0, 1, 1], [], []>} : vector<16x16xbf16>, vector<16x16xbf16>, vector<16x16xf32> -> vector<16x16xf32>
    %105 = tpu.reciprocal %101 {approx = true} : vector<16x1xf32> -> vector<16x1xf32>
    %106 = vector.broadcast %105 : vector<16x1xf32> to vector<16x16xf32>
    %107 = arith.mulf %104, %106 : vector<16x16xf32>
    %108 = vector.extract_strided_slice %78 {offsets = [0, 1], sizes = [16, 1], strides = [1, 1]} : vector<16x2xf32> to vector<16x1xf32>
    %109 = vector.extract_strided_slice %80 {offsets = [1, 0], sizes = [1, 16], strides = [1, 1]} : vector<2x16xf32> to vector<1x16xf32>
    %110 = vector.broadcast %108 : vector<16x1xf32> to vector<16x16xf32>
    %111 = vector.broadcast %109 : vector<1x16xf32> to vector<16x16xf32>
    %112 = arith.addf %110, %111 : vector<16x16xf32>
    %cst_32 = arith.constant 0.000000e+00 : f32
    %113 = vector.broadcast %cst_32 : f32 to vector<16x16xf32>
    %114 = arith.cmpf oge, %112, %113 : vector<16x16xf32>
    %cst_33 = arith.constant 2.000000e-01 : f32
    %115 = vector.broadcast %cst_33 : f32 to vector<16x16xf32>
    %116 = arith.mulf %115, %112 : vector<16x16xf32>
    %117 = arith.select %114, %112, %116 : vector<16x16xi1>, vector<16x16xf32>
    %cst_34 = arith.constant dense<0xFF800000> : vector<16xf32>
    %118 = vector.multi_reduction <maximumf>, %117, %cst_34 [1] : vector<16x16xf32> to vector<16xf32>
    %119 = vector.shape_cast %118 : vector<16xf32> to vector<16x1xf32>
    %120 = vector.broadcast %119 : vector<16x1xf32> to vector<16x16xf32>
    %121 = arith.subf %117, %120 : vector<16x16xf32>
    %122 = math.exp %121 : vector<16x16xf32>
    %cst_35 = arith.constant 0.000000e+00 : f32
    %123 = vector.broadcast %cst_35 : f32 to vector<16x16xf32>
    %124 = arith.select %3, %122, %123 : vector<16x16xi1>, vector<16x16xf32>
    %cst_36 = arith.constant dense<0.000000e+00> : vector<16xf32>
    %125 = vector.multi_reduction <add>, %124, %cst_36 [1] : vector<16x16xf32> to vector<16xf32>
    %126 = vector.shape_cast %125 : vector<16xf32> to vector<16x1xf32>
    %cst_37 = arith.constant 1.000000e-30 : f32
    %127 = vector.broadcast %cst_37 : f32 to vector<16x1xf32>
    %128 = arith.maximumf %126, %127 : vector<16x1xf32>
    %129 = arith.truncf %124 : vector<16x16xf32> to vector<16x16xbf16>
    %130 = vector.extract_strided_slice %79 {offsets = [0, 16], sizes = [16, 16], strides = [1, 1]} : vector<16x32xbf16> to vector<16x16xbf16>
    %cst_38 = arith.constant dense<0.000000e+00> : vector<16x16xf32>
    %131 = tpu.matmul %129, %130, %cst_38 {dimension_numbers = #tpu.dot_dimension_numbers<[1], [0], [0], [1], [0, 0, 1, 1], [], []>} : vector<16x16xbf16>, vector<16x16xbf16>, vector<16x16xf32> -> vector<16x16xf32>
    %132 = tpu.reciprocal %128 {approx = true} : vector<16x1xf32> -> vector<16x1xf32>
    %133 = vector.broadcast %132 : vector<16x1xf32> to vector<16x16xf32>
    %134 = arith.mulf %131, %133 : vector<16x16xf32>
    %135 = tpu.concatenate %107, %134 in 1 : vector<16x16xf32>, vector<16x16xf32> -> vector<16x32xf32>
    %cst_39 = arith.constant 0.000000e+00 : f32
    %136 = vector.broadcast %cst_39 : f32 to vector<16x32xf32>
    %137 = arith.cmpf ogt, %135, %136 : vector<16x32xf32>
    %138 = math.exp %135 : vector<16x32xf32>
    %cst_40 = arith.constant 1.000000e+00 : f32
    %139 = vector.broadcast %cst_40 : f32 to vector<16x32xf32>
    %140 = arith.subf %138, %139 : vector<16x32xf32>
    %141 = arith.select %137, %135, %140 : vector<16x32xi1>, vector<16x32xf32>
    %142 = arith.truncf %141 : vector<16x32xf32> to vector<16x32xbf16>
    %c0_41 = arith.constant 0 : index
    %c0_42 = arith.constant 0 : index
    %143 = vector.load %arg4[%c0_41, %c0_42] : memref<32x20xbf16, #tpu.memory_space<vmem>>, vector<32x20xbf16>
    %cst_43 = arith.constant dense<0.000000e+00> : vector<16x20xf32>
    %144 = tpu.matmul %142, %143, %cst_43 {dimension_numbers = #tpu.dot_dimension_numbers<[1], [0], [0], [1], [0, 0, 1, 1], [], []>} : vector<16x32xbf16>, vector<32x20xbf16>, vector<16x20xf32> -> vector<16x20xf32>
    %145 = vector.extract_strided_slice %144 {offsets = [0, 0], sizes = [16, 16], strides = [1, 1]} : vector<16x20xf32> to vector<16x16xf32>
    %146 = vector.extract_strided_slice %144 {offsets = [0, 16], sizes = [16, 2], strides = [1, 1]} : vector<16x20xf32> to vector<16x2xf32>
    %147 = vector.extract_strided_slice %144 {offsets = [0, 18], sizes = [16, 2], strides = [1, 1]} : vector<16x20xf32> to vector<16x2xf32>
    %148 = arith.truncf %145 : vector<16x16xf32> to vector<16x16xbf16>
    %149 = tpu.transpose %146, [1, 0] : vector<16x2xf32> -> vector<2x16xf32>
    %150 = vector.extract_strided_slice %147 {offsets = [0, 0], sizes = [16, 1], strides = [1, 1]} : vector<16x2xf32> to vector<16x1xf32>
    %151 = vector.extract_strided_slice %149 {offsets = [0, 0], sizes = [1, 16], strides = [1, 1]} : vector<2x16xf32> to vector<1x16xf32>
    %152 = vector.broadcast %150 : vector<16x1xf32> to vector<16x16xf32>
    %153 = vector.broadcast %151 : vector<1x16xf32> to vector<16x16xf32>
    %154 = arith.addf %152, %153 : vector<16x16xf32>
    %cst_44 = arith.constant 0.000000e+00 : f32
    %155 = vector.broadcast %cst_44 : f32 to vector<16x16xf32>
    %156 = arith.cmpf oge, %154, %155 : vector<16x16xf32>
    %cst_45 = arith.constant 2.000000e-01 : f32
    %157 = vector.broadcast %cst_45 : f32 to vector<16x16xf32>
    %158 = arith.mulf %157, %154 : vector<16x16xf32>
    %159 = arith.select %156, %154, %158 : vector<16x16xi1>, vector<16x16xf32>
    %cst_46 = arith.constant dense<0xFF800000> : vector<16xf32>
    %160 = vector.multi_reduction <maximumf>, %159, %cst_46 [1] : vector<16x16xf32> to vector<16xf32>
    %161 = vector.shape_cast %160 : vector<16xf32> to vector<16x1xf32>
    %162 = vector.broadcast %161 : vector<16x1xf32> to vector<16x16xf32>
    %163 = arith.subf %159, %162 : vector<16x16xf32>
    %164 = math.exp %163 : vector<16x16xf32>
    %cst_47 = arith.constant 0.000000e+00 : f32
    %165 = vector.broadcast %cst_47 : f32 to vector<16x16xf32>
    %166 = arith.select %3, %164, %165 : vector<16x16xi1>, vector<16x16xf32>
    %cst_48 = arith.constant dense<0.000000e+00> : vector<16xf32>
    %167 = vector.multi_reduction <add>, %166, %cst_48 [1] : vector<16x16xf32> to vector<16xf32>
    %168 = vector.shape_cast %167 : vector<16xf32> to vector<16x1xf32>
    %cst_49 = arith.constant 1.000000e-30 : f32
    %169 = vector.broadcast %cst_49 : f32 to vector<16x1xf32>
    %170 = arith.maximumf %168, %169 : vector<16x1xf32>
    %171 = arith.truncf %166 : vector<16x16xf32> to vector<16x16xbf16>
    %172 = vector.extract_strided_slice %148 {offsets = [0, 0], sizes = [16, 8], strides = [1, 1]} : vector<16x16xbf16> to vector<16x8xbf16>
    %cst_50 = arith.constant dense<0.000000e+00> : vector<16x8xf32>
    %173 = tpu.matmul %171, %172, %cst_50 {dimension_numbers = #tpu.dot_dimension_numbers<[1], [0], [0], [1], [0, 0, 1, 1], [], []>} : vector<16x16xbf16>, vector<16x8xbf16>, vector<16x8xf32> -> vector<16x8xf32>
    %cst_51 = arith.constant 5.000000e-01 : f32
    %174 = vector.broadcast %cst_51 : f32 to vector<16x1xf32>
    %175 = arith.divf %174, %170 : vector<16x1xf32>
    %176 = vector.broadcast %175 : vector<16x1xf32> to vector<16x8xf32>
    %177 = arith.mulf %173, %176 : vector<16x8xf32>
    %178 = vector.extract_strided_slice %147 {offsets = [0, 1], sizes = [16, 1], strides = [1, 1]} : vector<16x2xf32> to vector<16x1xf32>
    %179 = vector.extract_strided_slice %149 {offsets = [1, 0], sizes = [1, 16], strides = [1, 1]} : vector<2x16xf32> to vector<1x16xf32>
    %180 = vector.broadcast %178 : vector<16x1xf32> to vector<16x16xf32>
    %181 = vector.broadcast %179 : vector<1x16xf32> to vector<16x16xf32>
    %182 = arith.addf %180, %181 : vector<16x16xf32>
    %cst_52 = arith.constant 0.000000e+00 : f32
    %183 = vector.broadcast %cst_52 : f32 to vector<16x16xf32>
    %184 = arith.cmpf oge, %182, %183 : vector<16x16xf32>
    %cst_53 = arith.constant 2.000000e-01 : f32
    %185 = vector.broadcast %cst_53 : f32 to vector<16x16xf32>
    %186 = arith.mulf %185, %182 : vector<16x16xf32>
    %187 = arith.select %184, %182, %186 : vector<16x16xi1>, vector<16x16xf32>
    %cst_54 = arith.constant dense<0xFF800000> : vector<16xf32>
    %188 = vector.multi_reduction <maximumf>, %187, %cst_54 [1] : vector<16x16xf32> to vector<16xf32>
    %189 = vector.shape_cast %188 : vector<16xf32> to vector<16x1xf32>
    %190 = vector.broadcast %189 : vector<16x1xf32> to vector<16x16xf32>
    %191 = arith.subf %187, %190 : vector<16x16xf32>
    %192 = math.exp %191 : vector<16x16xf32>
    %cst_55 = arith.constant 0.000000e+00 : f32
    %193 = vector.broadcast %cst_55 : f32 to vector<16x16xf32>
    %194 = arith.select %3, %192, %193 : vector<16x16xi1>, vector<16x16xf32>
    %cst_56 = arith.constant dense<0.000000e+00> : vector<16xf32>
    %195 = vector.multi_reduction <add>, %194, %cst_56 [1] : vector<16x16xf32> to vector<16xf32>
    %196 = vector.shape_cast %195 : vector<16xf32> to vector<16x1xf32>
    %cst_57 = arith.constant 1.000000e-30 : f32
    %197 = vector.broadcast %cst_57 : f32 to vector<16x1xf32>
    %198 = arith.maximumf %196, %197 : vector<16x1xf32>
    %199 = arith.truncf %194 : vector<16x16xf32> to vector<16x16xbf16>
    %200 = vector.extract_strided_slice %148 {offsets = [0, 8], sizes = [16, 8], strides = [1, 1]} : vector<16x16xbf16> to vector<16x8xbf16>
    %cst_58 = arith.constant dense<0.000000e+00> : vector<16x8xf32>
    %201 = tpu.matmul %199, %200, %cst_58 {dimension_numbers = #tpu.dot_dimension_numbers<[1], [0], [0], [1], [0, 0, 1, 1], [], []>} : vector<16x16xbf16>, vector<16x8xbf16>, vector<16x8xf32> -> vector<16x8xf32>
    %cst_59 = arith.constant 5.000000e-01 : f32
    %202 = vector.broadcast %cst_59 : f32 to vector<16x1xf32>
    %203 = arith.divf %202, %198 : vector<16x1xf32>
    %204 = vector.broadcast %203 : vector<16x1xf32> to vector<16x8xf32>
    %205 = arith.mulf %201, %204 : vector<16x8xf32>
    %206 = arith.addf %177, %205 : vector<16x8xf32>
    %c0_60 = arith.constant 0 : index
    %c0_61 = arith.constant 0 : index
    %207 = vector.load %arg5[%c0_60, %c0_61] : memref<16x8xf32, #tpu.memory_space<vmem>>, vector<16x8xf32>
    tpu.vector_store %arg5[%c0_60, %c0_61], %206 {strides = array<i32>} : memref<16x8xf32, #tpu.memory_space<vmem>>, vector<16x8xf32>,
    return
  }
}

</mosaic_0001>

<bundles_post_ra>
// kernel: tpu_custom_call.1
= control target key start
LH: loop header
LB: loop body
LE: loop exit
PB: predicated region body
PF: predicated region fallthrough
CT: control target
= control target key end

     0   :  { %10 = vsyncpa [#allocation3], 0  ;;  %s1170_s18 = smov [#allocation2]   ;;  %s1369_s0 = inlined_call_operand.vmem [shape: bf16[16,16], index: 0, kind: input, shape index: {}]   ;;  %s1370_s1 = inlined_call_operand.vmem [shape: s8[16,16], index: 1, kind: input, shape index: {}]   ;;  %s1371_s2 = inlined_call_operand.hbm [shape: bf16[16,36], index: 2, kind: input, shape index: {}]   ;;  %s1372_s3 = inlined_call_operand.vmem [shape: bf16[32,36], index: 3, kind: input, shape index: {}]   ;;  %s1373_s4 = inlined_call_operand.vmem [shape: bf16[32,20], index: 4, kind: input, shape index: {}]   ;;  %s1374_s5 = inlined_call_operand.vmem [shape: f32[16,8], index: 5, kind: output, shape index: {}]  }
   0x1   :  { %s20_s19 = sshll.u32 %s1170_s18, 4  ;;  %s1146_s22 = scalar_lea.hbm %s1371_s2, 128  ;;  %s21_s19 = int_to_ptr.vmem [resolvable:$true] %s20_s19 }
   0x2   :  { %p1147_p0 = scmp.ne.s32.totalorder %s1371_s2, %s1146_s22  ;;  %p1150_p1 = scmp.lt.u32.totalorder %s1146_s22, %s1371_s2 }
   0x4   :  { %p1152_p2 = pnand %p1150_p1, %p1147_p0 }
   0x6   :  { %1155 = shalt.err (!%p1152_p2)
}
   0x7   :  { %s1156_s27 = scalar_lea.vmem %s21_s19, 128  ;;  %p1161_p4 = scmp.lt.s32.totalorder %s21_s19, %s21_s19 }
   0x8   :  { %p1157_p3 = scmp.ne.s32.totalorder %s21_s19, %s1156_s27  ;;  %p1162_p5 = scmp.lt.s32.totalorder %s1156_s27, %s1156_s27 }
   0xa   :  { %p1163_p6 = por %p1162_p5, %p1161_p4 }
   0xc   :  { %p1164_p7 = pnand %p1163_p6, %p1157_p3 }
   0xe   :  { %1167 = shalt.err (!%p1164_p7)
}
   0xf   :  { %s1171_s28 = smov 64   ;;  %s1172_s29 = smov 4  }
  0x10   :  { %26 = dma.hbm_to_vmem [thread:$0]  %s1371_s2, 128, %s21_s19, [#allocation3], %s1171_s28, %s1171_s28, %s1172_s29  }
  0x11   :  { %1168 = dma.done.wait [#allocation3], 128  }
  0x12   :  { %1169 = vsyncadd [#allocation3], 4294967168  ;;  %v1173_v0 = vmov 0.0   ;;  %vm1174_vm0 = vmmov 0   ;;  %v1175_v1 = vmov 35   ;;  %v1084_v2 = vld [vmem:[#allocation2] sm:$0xff]   ;;  %v152_v13 = vlaneseq }
  0x13   :  { %1004 = vmatprep.subr.bf16.mxu0 %v1173_v0  ;;  %1006 = vmatprep.mubr.msk.bf16.mxu0 %vm1174_vm0, %v1173_v0  ;;  %v1085_v3 = vld [vmem:[%s1369_s0] sm:$0xff]   ;;  %vm58_vm1 = vcmask 130048   ;;  %s1176_s2 = smov 96   ;;  %v1177_v9 = vmov 34   ;;  %s1178_s0 = smov 112   ;;  %vm367_vm10 = vcmask 261120  }
  0x14   :  { %1075 = vset.pattern.permute.xlu1 %v1175_v1  ;;  %1010 = vmatprep.subr.bf16.mxu1 %v1173_v0  ;;  %v153_v15 = vshrl.u32 %v152_v13, 7  ;;  %v981_v43 = vld [vmem:[%s1370_s1] sm:$0xf]   ;;  %s1179_s12 = smov 16  }
  0x15   :  { %1012 = vmatprep.mubr.msk.bf16.mxu1 %vm1174_vm0, %v1173_v0  ;;  %1005 = vmatpush3.bf16.msra.mxu0 %v1084_v2  ;;  %v983_v47 = vunpack.c.1.s8 %v981_v43  ;;  %v982_v48 = vunpack.c.0.s8 %v981_v43 }
  0x16   :  { %1016 = vmatprep.subr.bf16.mxu0 %v1173_v0  ;;  %v1242_v17 = vsub.s32 0, %v153_v15  ;;  %v1244_v18 = vsub.s32 1, %v153_v15 }
  0x17   :  { %v1257_v49 = vcvt.s32.f32 %v983_v47  ;;  %v1259_v50 = vcvt.s32.f32 %v982_v48 }
  0x18   :  { %1007 = vmatmul.mubr.msk.bf16.vlgmr.msra.gmra.mrb[0].mxu0 %vm58_vm1, %v1085_v3 }
  0x19   :  { %1018 = vmatprep.mubr.msk.bf16.mxu0 %vm1174_vm0, %v1173_v0  ;;  %vm42_vm6 = vcmp.gt.f32.partialorder %v1257_v49, 0.0  ;;  %vm41_vm7 = vcmp.gt.f32.partialorder %v1259_v50, 0.0 }
  0xeb   :  { %v96_v4 = vpop.f32.mrb[0].mxu0 }
  0xec   :  { %236 = vperm.xlu1 %1075, %v96_v4   ;;  %106 = vrot.lane.b32.xlu0 %v96_v4, %s1176_s2  ;;  %v1008_v5 = vpop.f32.mrb[1].mxu0 }
  0xed   :  { %v99_v6 = vpop.f32.mrb[2].mxu0 }
  0xee   :  { %v1009_v7 = vpop.f32.mrb[3].mxu0  ;;  %v103_v8 = vpack.c.bf16 %v99_v6, %v96_v4 }
  0xf0   :  { %240 = vperm.xlu1 %1075, %v99_v6   ;;  %108 = vrot.lane.b32.xlu0 %v99_v6, %s1176_s2 }
  0xf1   :  { %1011 = vmatpush3.bf16.msra.mxu1 %v103_v8 }
  0xf2   :  { %1022 = vmatprep.subr.bf16.mxu1 %v1173_v0 }
  0xf4   :  { %1076 = vset.pattern.permute.xlu1 %v1177_v9 }
  0xf5   :  { %145 = vperm.xlu1 %1076, %v96_v4  }
  0xf9   :  { %149 = vperm.xlu1 %1076, %v99_v6  }
  0xfd   :  { %1078 = vset.pattern.permute.xlu1 %v1175_v1 }
 0x15e   :  { %v107_v10 = vpop.permute.xlu0 %106 }
 0x15f   :  { %112 = vxpose.xlu0.b32.start [1/2] (short) (narrow) %v107_v10, 8 }
 0x162   :  { %v109_v11 = vpop.permute.xlu0 %108 }
 0x163   :  { %113 = vxpose.xlu0.b32.end [2/2] (short) (narrow) %v109_v11, 8 }
 0x16b   :  { %v237_v12 = vpop.permute.xlu1 %236 }
 0x16f   :  { %v241_v14 = vpop.permute.xlu1 %240 }
 0x174   :  { %v146_v16 = vpop.permute.xlu1 %145 }
 0x178   :  { %v150_v22 = vpop.permute.xlu1 %149 }
 0x18c   :  { %1077 = vset.pattern.permute.xlu0 %v1175_v1 }
 0x1df   :  { %v128_v19 = vpop.trf.xlu0 }
 0x1e0   :  { %v155_v20 = vrot.slane %v128_v19, %v1242_v17  ;;  %v246_v21 = vrot.slane %v128_v19, %v1244_v18 }
 0x1e2   :  { %v157_v23 = vadd.f32 %v155_v20, %v150_v22  ;;  %v247_v24 = vadd.f32 %v246_v21, %v237_v12  ;;  %v248_v25 = vadd.f32 %v246_v21, %v241_v14  ;;  %v156_v35 = vadd.f32 %v155_v20, %v146_v16  ;;  %v1086_v21 = vld [vmem:[%s1372_s3] sm:$0xff]  }
 0x1e4   :  { %vm250_vm2 = vcmp.ge.f32.partialorder %v248_v25, 0.0  ;;  %v252_v26 = vmul.f32 0.2, %v248_v25  ;;  %vm249_vm3 = vcmp.ge.f32.partialorder %v247_v24, 0.0  ;;  %v251_v27 = vmul.f32 0.2, %v247_v24 }
 0x1e5   :  { %vm159_vm4 = vcmp.ge.f32.partialorder %v157_v23, 0.0  ;;  %v161_v28 = vmul.f32 0.2, %v157_v23  ;;  %v160_v36 = vmul.f32 0.2, %v156_v35  ;;  %vm158_vm5 = vcmp.ge.f32.partialorder %v156_v35, 0.0 }
 0x1e6   :  { %v254_v29 = vsel %vm250_vm2, %v248_v25, %v252_v26  ;;  %v253_v30 = vsel %vm249_vm3, %v247_v24, %v251_v27  ;;  %v1087_v24 = vld [vmem:[%s1372_s3 + $0x8] sm:$0xff]  }
 0x1e7   :  { %v258_v31 = vsel %vm58_vm1, %v254_v29, -inf  ;;  %v255_v32 = vsel %vm58_vm1, %v253_v30, -inf  ;;  %v163_v33 = vsel %vm159_vm4, %v157_v23, %v161_v28  ;;  %v162_v37 = vsel %vm158_vm5, %v156_v35, %v160_v36 }
 0x1e8   :  { %259 = vmax.xlane.f32.xlu0 %v258_v31  ;;  %256 = vmax.xlane.f32.xlu1 %v255_v32  ;;  %v167_v34 = vsel %vm58_vm1, %v163_v33, -inf  ;;  %v164_v38 = vsel %vm58_vm1, %v162_v37, -inf }
 0x1ec   :  { %168 = vmax.xlane.f32.xlu0 %v167_v34 }
 0x1f9   :  { %279 = vrot.lane.b32.xlu1 %v103_v8, %s1178_s0 }
 0x21d   :  { %165 = vmax.xlane.f32.xlu1 %v164_v38 }
 0x275   :  { %v260_v39 = vpop.xlane.xlu0 %259  ;;  %v257_v40 = vpop.xlane.xlu1 %256 }
 0x276   :  { %v262_v41 = vsub.f32 %v254_v29, %v260_v39  ;;  %v261_v42 = vsub.f32 %v253_v30, %v257_v40 }
 0x278   :  { %v265_v44 = vmul.f32 1.442695, %v262_v41  ;;  %v263_v45 = vmul.f32 1.442695, %v261_v42 }
 0x279   :  { %v280_v46 = vpop.permute.xlu1 %279  ;;  %v169_v58 = vpop.xlane.xlu0 %168 }
 0x27a   :  { %1090 = vpow2.f32 %v265_v44  ;;  %1017 = vmatpush3.bf16.msra.mxu0 %v280_v46  ;;  %v171_v59 = vsub.f32 %v163_v33, %v169_v58 }
 0x27b   :  { %1092 = vpow2.f32 %v263_v45  ;;  %1030 = vmatprep.subr.bf16.mxu0 %v1173_v0 }
 0x27c   :  { %v174_v60 = vmul.f32 1.442695, %v171_v59 }
 0x27e   :  { %1094 = vpow2.f32 %v174_v60 }
 0x284   :  { %v1091_v51 = vpop.eup %1090 }
 0x285   :  { %v1093_v52 = vpop.eup %1092  ;;  %v268_v53 = vsel %vm42_vm6, %v1091_v51, 0.0 }
 0x286   :  { %v267_v54 = vsel %vm41_vm7, %v1093_v52, 0.0  ;;  %v272_v57 = vsel %vm58_vm1, %v268_v53, 0.0 }
 0x287   :  { %v269_v55 = vsel %vm58_vm1, %v267_v54, 0.0  ;;  %v277_v56 = vpack.c.bf16 %v268_v53, %v267_v54 }
 0x288   :  { %270 = vadd.xlane.f32.xlu0 %v269_v55  ;;  %v1095_v1 = vpop.eup %1094 }
 0x289   :  { %1019 = vmatmul.mubr.msk.bf16.vlgmr.msra.gmra.mrb[4].mxu0 %vm58_vm1, %v277_v56  ;;  %v177_v4 = vsel %vm42_vm6, %v1095_v1, 0.0 }
 0x28a   :  { %1032 = vmatprep.mubr.msk.bf16.mxu0 %vm1174_vm0, %v1173_v0  ;;  %v181_v7 = vsel %vm58_vm1, %v177_v4, 0.0 }
 0x28c   :  { %273 = vadd.xlane.f32.xlu0 %v272_v57 }
 0x2aa   :  { %v166_v61 = vpop.xlane.xlu1 %165 }
 0x2ab   :  { %v170_v62 = vsub.f32 %v162_v37, %v166_v61 }
 0x2ad   :  { %v172_v63 = vmul.f32 1.442695, %v170_v62 }
 0x2af   :  { %1096 = vpow2.f32 %v172_v63 }
 0x2b9   :  { %v1097_v2 = vpop.eup %1096 }
 0x2ba   :  { %v176_v3 = vsel %vm41_vm7, %v1097_v2, 0.0 }
 0x2bb   :  { %v178_v5 = vsel %vm58_vm1, %v176_v3, 0.0  ;;  %v186_v6 = vpack.c.bf16 %v177_v4, %v176_v3 }
 0x2bc   :  { %179 = vadd.xlane.f32.xlu0 %v178_v5 }
 0x2bd   :  { %1013 = vmatmul.mubr.msk.bf16.vlgmr.msra.gmra.mrb[0].mxu1 %vm58_vm1, %v186_v6 }
 0x2be   :  { %1026 = vmatprep.mubr.msk.bf16.mxu1 %vm1174_vm0, %v1173_v0  ;;  %1023 = vmatpush3.bf16.msra.mxu1 %v1086_v21 }
 0x2bf   :  { %1024 = vmatprep.subr.bf16.mxu1 %v1173_v0 }
 0x2c0   :  { %182 = vadd.xlane.f32.xlu0 %v181_v7 }
 0x2c2   :  { %1025 = vmatpush3.bf16.msra.mxu1 %v1087_v24 }
 0x2c3   :  { %1036 = vmatprep.subr.bf16.mxu1 %v1173_v0 }
 0x315   :  { %v271_v8 = vpop.xlane.xlu0 %270 }
 0x316   :  { %v275_v11 = vmax.f32 %v271_v8, 1e-30 }
 0x318   :  { %1098 = vrcp.f32 %v275_v11 }
 0x319   :  { %v274_v10 = vpop.xlane.xlu0 %273 }
 0x31a   :  { %v276_v12 = vmax.f32 %v274_v10, 1e-30 }
 0x31c   :  { %1100 = vrcp.f32 %v276_v12 }
 0x322   :  { %v1099_v13 = vpop.eup %1098 }
 0x326   :  { %v1101_v19 = vpop.eup %1100 }
 0x349   :  { %v180_v29 = vpop.xlane.xlu0 %179 }
 0x34a   :  { %v184_v31 = vmax.f32 %v180_v29, 1e-30 }
 0x34c   :  { %1102 = vrcp.f32 %v184_v31 }
 0x34d   :  { %v183_v30 = vpop.xlane.xlu0 %182 }
 0x34e   :  { %v185_v32 = vmax.f32 %v183_v30, 1e-30 }
 0x350   :  { %1104 = vrcp.f32 %v185_v32 }
 0x356   :  { %v1103_v33 = vpop.eup %1102 }
 0x35a   :  { %v1105_v35 = vpop.eup %1104 }
 0x35c   :  { %v319_v14 = vpop.f32.mrb[4].mxu0 }
 0x35d   :  { %v328_v15 = vmul.f32 %v1099_v13, %v319_v14  ;;  %v1020_v16 = vpop.f32.mrb[5].mxu0 }
 0x35e   :  { %v322_v20 = vpop.f32.mrb[6].mxu0 }
 0x35f   :  { %v329_v22 = vmul.f32 %v1101_v19, %v322_v20  ;;  %v1021_v23 = vpop.f32.mrb[7].mxu0  ;;  %332 = vrot.lane.b32.xlu1 %v328_v15, %s1179_s12 }
 0x361   :  { %334 = vrot.lane.b32.xlu0 %v329_v22, %s1179_s12 }
 0x390   :  { %v224_v25 = vpop.f32.mrb[0].mxu1 }
 0x391   :  { %v1014_v26 = vpop.f32.mrb[1].mxu1  ;;  %v233_v34 = vmul.f32 %v1103_v33, %v224_v25 }
 0x392   :  { %v227_v27 = vpop.f32.mrb[2].mxu1 }
 0x393   :  { %v1015_v28 = vpop.f32.mrb[3].mxu1  ;;  %v234_v37 = vmul.f32 %v1105_v35, %v227_v27 }
 0x3d1   :  { %v333_v36 = vpop.permute.xlu1 %332 }
 0x3d2   :  { %v338_v38 = vsel %vm58_vm1, %v233_v34, %v333_v36 }
 0x3d3   :  { %v342_v39 = vmul.f32 1.442695, %v338_v38  ;;  %v335_v40 = vpop.permute.xlu0 %334  ;;  %vm340_vm8 = vcmp.gt.f32.partialorder %v338_v38, 0.0 }
 0x3d4   :  { %v339_v41 = vsel %vm58_vm1, %v234_v37, %v335_v40 }
 0x3d5   :  { %1106 = vpow2.f32 %v342_v39  ;;  %v344_v42 = vmul.f32 1.442695, %v339_v41  ;;  %vm341_vm9 = vcmp.gt.f32.partialorder %v339_v41, 0.0 }
 0x3d7   :  { %1108 = vpow2.f32 %v344_v42 }
 0x3df   :  { %v1107_v43 = vpop.eup %1106 }
 0x3e0   :  { %v966_v44 = vadd.f32 -1.0, %v1107_v43 }
 0x3e1   :  { %v1109_v45 = vpop.eup %1108 }
 0x3e2   :  { %v967_v46 = vadd.f32 -1.0, %v1109_v45  ;;  %v348_v47 = vsel %vm340_vm8, %v338_v38, %v966_v44 }
 0x3e4   :  { %v349_v48 = vsel %vm341_vm9, %v339_v41, %v967_v46 }
 0x3e5   :  { %v350_v51 = vpack.c.bf16 %v349_v48, %v348_v47 }
 0x3e7   :  { %1027 = vmatmul.mubr.msk.bf16.vlgmr.msra.gmra.mrb[4].mxu1 %vm367_vm10, %v350_v51 }
 0x3e8   :  { %1038 = vmatprep.mubr.msk.bf16.mxu1 %vm1174_vm0, %v1173_v0 }
 0x4ba   :  { %v405_v52 = vpop.f32.mrb[4].mxu1 }
 0x4bb   :  { %545 = vperm.xlu0 %1077, %v405_v52   ;;  %415 = vrot.lane.b32.xlu1 %v405_v52, %s1176_s2  ;;  %v1028_v53 = vpop.f32.mrb[5].mxu1 }
 0x4bc   :  { %v408_v54 = vpop.f32.mrb[6].mxu1 }
 0x4bd   :  { %v412_v55 = vpack.c.bf16 %v408_v54, %v405_v52  ;;  %v1029_v56 = vpop.f32.mrb[7].mxu1 }
 0x4bf   :  { %1079 = vset.pattern.permute.xlu0 %v1177_v9  ;;  %417 = vrot.lane.b32.xlu1 %v408_v54, %s1176_s2 }
 0x4c0   :  { %1031 = vmatpush3.bf16.msra.mxu0 %v412_v55  ;;  %454 = vperm.xlu0 %1079, %v405_v52  }
 0x4c1   :  { %1042 = vmatprep.subr.bf16.mxu0 %v1173_v0 }
 0x4c3   :  { %549 = vperm.xlu1 %1078, %v408_v54  }
 0x4c4   :  { %458 = vperm.xlu0 %1079, %v408_v54  }
 0x52d   :  { %v416_v57 = vpop.permute.xlu1 %415 }
 0x52e   :  { %421 = vxpose.xlu1.b32.start [1/2] (short) (narrow) %v416_v57, 8 }
 0x531   :  { %v418_v58 = vpop.permute.xlu1 %417 }
 0x532   :  { %422 = vxpose.xlu1.b32.end [2/2] (short) (narrow) %v418_v58, 8 }
 0x53a   :  { %v546_v59 = vpop.permute.xlu0 %545 }
 0x53f   :  { %v455_v60 = vpop.permute.xlu0 %454 }
 0x542   :  { %v550_v61 = vpop.permute.xlu1 %549 }
 0x543   :  { %v459_v1 = vpop.permute.xlu0 %458 }
 0x5ae   :  { %v437_v62 = vpop.trf.xlu1 }
 0x5af   :  { %v464_v63 = vrot.slane %v437_v62, %v1242_v17  ;;  %v555_v9 = vrot.slane %v437_v62, %v1244_v18 }
 0x5b1   :  { %v466_v2 = vadd.f32 %v464_v63, %v459_v1  ;;  %v556_v3 = vadd.f32 %v555_v9, %v546_v59  ;;  %v557_v4 = vadd.f32 %v555_v9, %v550_v61  ;;  %v465_v15 = vadd.f32 %v464_v63, %v455_v60  ;;  %v1088_v60 = vld [vmem:[%s1373_s4] sm:$0xff]   ;;  %v1089_v63 = vld [vmem:[%s1373_s4 + $0x8] sm:$0xff]   ;;  %s1182_s4 = smov 120  }
 0x5b2   :  { %v1180_v9 = vmov 18  }
 0x5b3   :  { %vm559_vm11 = vcmp.ge.f32.partialorder %v557_v4, 0.0  ;;  %v561_v5 = vmul.f32 0.2, %v557_v4  ;;  %vm558_vm12 = vcmp.ge.f32.partialorder %v556_v3, 0.0  ;;  %v560_v6 = vmul.f32 0.2, %v556_v3  ;;  %1080 = vset.pattern.permute.xlu0 %v1180_v9 }
 0x5b4   :  { %vm468_vm13 = vcmp.ge.f32.partialorder %v466_v2, 0.0  ;;  %v470_v7 = vmul.f32 0.2, %v466_v2  ;;  %v469_v16 = vmul.f32 0.2, %v465_v15  ;;  %vm467_vm14 = vcmp.ge.f32.partialorder %v465_v15, 0.0 }
 0x5b5   :  { %v563_v8 = vsel %vm559_vm11, %v557_v4, %v561_v5  ;;  %v562_v10 = vsel %vm558_vm12, %v556_v3, %v560_v6 }
 0x5b6   :  { %v567_v11 = vsel %vm58_vm1, %v563_v8, -inf  ;;  %v564_v12 = vsel %vm58_vm1, %v562_v10, -inf  ;;  %v472_v13 = vsel %vm468_vm13, %v466_v2, %v470_v7  ;;  %v471_v19 = vsel %vm467_vm14, %v465_v15, %v469_v16 }
 0x5b7   :  { %568 = vmax.xlane.f32.xlu1 %v567_v11  ;;  %565 = vmax.xlane.f32.xlu0 %v564_v12  ;;  %v476_v14 = vsel %vm58_vm1, %v472_v13, -inf  ;;  %v473_v20 = vsel %vm58_vm1, %v471_v19, -inf }
 0x5bb   :  { %477 = vmax.xlane.f32.xlu1 %v476_v14 }
 0x5cd   :  { %588 = vrot.lane.b32.xlu0 %v412_v55, %s1178_s0 }
 0x5ec   :  { %474 = vmax.xlane.f32.xlu0 %v473_v20 }
 0x644   :  { %v569_v21 = vpop.xlane.xlu1 %568  ;;  %v566_v22 = vpop.xlane.xlu0 %565 }
 0x645   :  { %v571_v23 = vsub.f32 %v563_v8, %v569_v21  ;;  %v570_v24 = vsub.f32 %v562_v10, %v566_v22 }
 0x647   :  { %v574_v25 = vmul.f32 1.442695, %v571_v23  ;;  %v572_v26 = vmul.f32 1.442695, %v570_v24 }
 0x648   :  { %v478_v27 = vpop.xlane.xlu1 %477  ;;  %v589_v28 = vpop.permute.xlu0 %588 }
 0x649   :  { %1110 = vpow2.f32 %v574_v25  ;;  %v480_v29 = vsub.f32 %v472_v13, %v478_v27  ;;  %1037 = vmatpush3.bf16.msra.mxu1 %v589_v28 }
 0x64a   :  { %1112 = vpow2.f32 %v572_v26  ;;  %1050 = vmatprep.subr.bf16.mxu1 %v1173_v0 }
 0x64b   :  { %v483_v30 = vmul.f32 1.442695, %v480_v29  ;;  %v1181_v29 = vmov 19  }
 0x64c   :  { %1081 = vset.pattern.permute.xlu1 %v1181_v29 }
 0x64d   :  { %1114 = vpow2.f32 %v483_v30 }
 0x653   :  { %v1111_v31 = vpop.eup %1110 }
 0x654   :  { %v1113_v32 = vpop.eup %1112  ;;  %v577_v33 = vsel %vm42_vm6, %v1111_v31, 0.0 }
 0x655   :  { %v576_v34 = vsel %vm41_vm7, %v1113_v32, 0.0  ;;  %v581_v40 = vsel %vm58_vm1, %v577_v33, 0.0 }
 0x656   :  { %v578_v35 = vsel %vm58_vm1, %v576_v34, 0.0  ;;  %v586_v36 = vpack.c.bf16 %v577_v33, %v576_v34 }
 0x657   :  { %v1115_v37 = vpop.eup %1114  ;;  %579 = vadd.xlane.f32.xlu1 %v578_v35 }
 0x658   :  { %1039 = vmatmul.mubr.msk.bf16.vlgmr.msra.gmra.mrb[8].mxu1 %vm58_vm1, %v586_v36  ;;  %v486_v38 = vsel %vm42_vm6, %v1115_v37, 0.0 }
 0x659   :  { %v490_v39 = vsel %vm58_vm1, %v486_v38, 0.0  ;;  %1052 = vmatprep.mubr.msk.bf16.mxu1 %vm1174_vm0, %v1173_v0 }
 0x65a   :  { %491 = vadd.xlane.f32.xlu0 %v490_v39 }
 0x65b   :  { %582 = vadd.xlane.f32.xlu1 %v581_v40 }
 0x679   :  { %v475_v41 = vpop.xlane.xlu0 %474 }
 0x67a   :  { %v479_v42 = vsub.f32 %v471_v19, %v475_v41 }
 0x67c   :  { %v481_v43 = vmul.f32 1.442695, %v479_v42 }
 0x67e   :  { %1116 = vpow2.f32 %v481_v43 }
 0x688   :  { %v1117_v44 = vpop.eup %1116 }
 0x689   :  { %v485_v45 = vsel %vm41_vm7, %v1117_v44, 0.0 }
 0x68a   :  { %v487_v46 = vsel %vm58_vm1, %v485_v45, 0.0  ;;  %v495_v47 = vpack.c.bf16 %v486_v38, %v485_v45 }
 0x68b   :  { %488 = vadd.xlane.f32.xlu1 %v487_v46 }
 0x68c   :  { %1033 = vmatmul.mubr.msk.bf16.vlgmr.msra.gmra.mrb[8].mxu0 %vm58_vm1, %v495_v47 }
 0x68d   :  { %1046 = vmatprep.mubr.msk.bf16.mxu0 %vm1174_vm0, %v1173_v0  ;;  %1043 = vmatpush3.bf16.msra.mxu0 %v1088_v60 }
 0x68e   :  { %1044 = vmatprep.subr.bf16.mxu0 %v1173_v0 }
 0x691   :  { %1045 = vmatpush3.bf16.msra.mxu0 %v1089_v63 }
 0x692   :  { %1056 = vmatprep.subr.bf16.mxu0 %v1173_v0 }
 0x6e4   :  { %v580_v48 = vpop.xlane.xlu1 %579 }
 0x6e5   :  { %v584_v52 = vmax.f32 %v580_v48, 1e-30 }
 0x6e7   :  { %1118 = vrcp.f32 %v584_v52  ;;  %v492_v6 = vpop.xlane.xlu0 %491 }
 0x6e8   :  { %v583_v51 = vpop.xlane.xlu1 %582  ;;  %v494_v8 = vmax.f32 %v492_v6, 1e-30 }
 0x6e9   :  { %v585_v53 = vmax.f32 %v583_v51, 1e-30 }
 0x6eb   :  { %1120 = vrcp.f32 %v585_v53 }
 0x6f1   :  { %v1119_v54 = vpop.eup %1118 }
 0x6f5   :  { %v1121_v58 = vpop.eup %1120 }
 0x718   :  { %v489_v5 = vpop.xlane.xlu1 %488 }
 0x719   :  { %v493_v7 = vmax.f32 %v489_v5, 1e-30 }
 0x71b   :  { %1122 = vrcp.f32 %v493_v7 }
 0x71c   :  { %1124 = vrcp.f32 %v494_v8 }
 0x725   :  { %v1123_v10 = vpop.eup %1122 }
 0x726   :  { %v1125_v12 = vpop.eup %1124 }
 0x72b   :  { %v628_v55 = vpop.f32.mrb[8].mxu1 }
 0x72c   :  { %v637_v56 = vmul.f32 %v1119_v54, %v628_v55  ;;  %v1040_v57 = vpop.f32.mrb[9].mxu1 }
 0x72d   :  { %v631_v59 = vpop.f32.mrb[10].mxu1 }
 0x72e   :  { %v638_v61 = vmul.f32 %v1121_v58, %v631_v59  ;;  %641 = vrot.lane.b32.xlu1 %v637_v56, %s1179_s12  ;;  %v1041_v62 = vpop.f32.mrb[11].mxu1 }
 0x730   :  { %643 = vrot.lane.b32.xlu0 %v638_v61, %s1179_s12 }
 0x75f   :  { %v533_v1 = vpop.f32.mrb[8].mxu0 }
 0x760   :  { %v1034_v2 = vpop.f32.mrb[9].mxu0  ;;  %v542_v11 = vmul.f32 %v1123_v10, %v533_v1 }
 0x761   :  { %v536_v3 = vpop.f32.mrb[10].mxu0 }
 0x762   :  { %v1035_v4 = vpop.f32.mrb[11].mxu0  ;;  %v543_v14 = vmul.f32 %v1125_v12, %v536_v3 }
 0x7a0   :  { %v642_v13 = vpop.permute.xlu1 %641 }
 0x7a1   :  { %v647_v15 = vsel %vm58_vm1, %v542_v11, %v642_v13 }
 0x7a2   :  { %v651_v16 = vmul.f32 1.442695, %v647_v15  ;;  %v644_v19 = vpop.permute.xlu0 %643  ;;  %vm649_vm15 = vcmp.gt.f32.partialorder %v647_v15, 0.0 }
 0x7a3   :  { %v648_v20 = vsel %vm58_vm1, %v543_v14, %v644_v19 }
 0x7a4   :  { %1126 = vpow2.f32 %v651_v16  ;;  %v653_v21 = vmul.f32 1.442695, %v648_v20  ;;  %vm650_vm2 = vcmp.gt.f32.partialorder %v648_v20, 0.0 }
 0x7a6   :  { %1128 = vpow2.f32 %v653_v21 }
 0x7ae   :  { %v1127_v22 = vpop.eup %1126 }
 0x7af   :  { %v973_v23 = vadd.f32 -1.0, %v1127_v22 }
 0x7b0   :  { %v1129_v24 = vpop.eup %1128 }
 0x7b1   :  { %v974_v25 = vadd.f32 -1.0, %v1129_v24  ;;  %v657_v26 = vsel %vm649_vm15, %v647_v15, %v973_v23 }
 0x7b3   :  { %v658_v27 = vsel %vm650_vm2, %v648_v20, %v974_v25 }
 0x7b4   :  { %v659_v28 = vpack.c.bf16 %v658_v27, %v657_v26 }
 0x7b6   :  { %1047 = vmatmul.mubr.msk.bf16.vlgmr.msra.gmra.mrb[12].mxu0 %vm367_vm10, %v659_v28 }
 0x7b7   :  { %1058 = vmatprep.mubr.msk.bf16.mxu0 %vm1174_vm0, %v1173_v0 }
 0x889   :  { %v713_v30 = vpop.f32.mrb[12].mxu0 }
 0x88a   :  { %762 = vperm.xlu0 %1080, %v713_v30   ;;  %723 = vrot.lane.b32.xlu1 %v713_v30, %s1178_s0  ;;  %v1048_v31 = vpop.f32.mrb[13].mxu0 }
 0x88b   :  { %v716_v32 = vpop.f32.mrb[14].mxu0 }
 0x88c   :  { %v720_v33 = vpack.c.bf16 %v716_v32, %v713_v30  ;;  %v1049_v34 = vpop.f32.mrb[15].mxu0 }
 0x88e   :  { %1083 = vset.pattern.permute.xlu0 %v1181_v29  ;;  %725 = vrot.lane.b32.xlu1 %v716_v32, %s1178_s0 }
 0x88f   :  { %1051 = vmatpush3.bf16.msra.mxu1 %v720_v33  ;;  %859 = vperm.xlu0 %1083, %v716_v32  }
 0x892   :  { %855 = vperm.xlu1 %1081, %v713_v30  }
 0x896   :  { %1082 = vset.pattern.permute.xlu1 %v1180_v9 }
 0x897   :  { %766 = vperm.xlu1 %1082, %v716_v32  }
 0x8fc   :  { %v724_v35 = vpop.permute.xlu1 %723 }
 0x8fd   :  { %729 = vxpose.xlu1.b32.start [1/2] (short) (narrow) %v724_v35, 8 }
 0x900   :  { %v726_v0 = vpop.permute.xlu1 %725 }
 0x901   :  { %730 = vxpose.xlu1.b32.end [2/2] (short) (narrow) %v726_v0, 8 }
 0x909   :  { %v763_v37 = vpop.permute.xlu0 %762 }
 0x90e   :  { %v860_v42 = vpop.permute.xlu0 %859 }
 0x911   :  { %v856_v36 = vpop.permute.xlu1 %855 }
 0x916   :  { %v767_v38 = vpop.permute.xlu1 %766 }
 0x97d   :  { %v745_v39 = vpop.trf.xlu1 }
 0x97e   :  { %v772_v40 = vrot.slane %v745_v39, %v1242_v17  ;;  %v865_v41 = vrot.slane %v745_v39, %v1244_v18 }
 0x980   :  { %v773_v43 = vadd.f32 %v772_v40, %v763_v37  ;;  %v774_v44 = vadd.f32 %v772_v40, %v767_v38  ;;  %v867_v45 = vadd.f32 %v865_v41, %v860_v42  ;;  %v866_v46 = vadd.f32 %v865_v41, %v856_v36 }
 0x982   :  { %vm869_vm0 = vcmp.ge.f32.partialorder %v867_v45, 0.0  ;;  %v871_v47 = vmul.f32 0.2, %v867_v45  ;;  %vm775_vm3 = vcmp.ge.f32.partialorder %v773_v43, 0.0  ;;  %v777_v48 = vmul.f32 0.2, %v773_v43 }
 0x983   :  { %vm776_vm4 = vcmp.ge.f32.partialorder %v774_v44, 0.0  ;;  %v778_v51 = vmul.f32 0.2, %v774_v44  ;;  %v870_v18 = vmul.f32 0.2, %v866_v46  ;;  %vm868_vm5 = vcmp.ge.f32.partialorder %v866_v46, 0.0 }
 0x984   :  { %v873_v52 = vsel %vm869_vm0, %v867_v45, %v871_v47  ;;  %v779_v53 = vsel %vm775_vm3, %v773_v43, %v777_v48 }
 0x985   :  { %v877_v54 = vsel %vm58_vm1, %v873_v52, -inf  ;;  %v781_v55 = vsel %vm58_vm1, %v779_v53, -inf  ;;  %v780_v17 = vsel %vm776_vm4, %v774_v44, %v778_v51  ;;  %v872_v57 = vsel %vm868_vm5, %v866_v46, %v870_v18 }
 0x986   :  { %878 = vmax.xlane.f32.xlu1 %v877_v54  ;;  %782 = vmax.xlane.f32.xlu0 %v781_v55  ;;  %v784_v56 = vsel %vm58_vm1, %v780_v17, -inf  ;;  %v874_v58 = vsel %vm58_vm1, %v872_v57, -inf }
 0x98a   :  { %785 = vmax.xlane.f32.xlu0 %v784_v56 }
 0x98e   :  { %875 = vmax.xlane.f32.xlu0 %v874_v58 }
 0x9a4   :  { %898 = vrot.lane.b32.xlu0 %v720_v33, %s1182_s4 }
 0xa13   :  { %v879_v59 = vpop.xlane.xlu1 %878  ;;  %v783_v60 = vpop.xlane.xlu0 %782 }
 0xa14   :  { %v787_v61 = vsub.f32 %v779_v53, %v783_v60  ;;  %v881_v62 = vsub.f32 %v873_v52, %v879_v59 }
 0xa16   :  { %v789_v63 = vmul.f32 1.442695, %v787_v61  ;;  %v884_v2 = vmul.f32 1.442695, %v881_v62 }
 0xa17   :  { %v786_v9 = vpop.xlane.xlu0 %785 }
 0xa18   :  { %v788_v1 = vsub.f32 %v780_v17, %v786_v9  ;;  %1130 = vpow2.f32 %v789_v63 }
 0xa1a   :  { %v791_v3 = vmul.f32 1.442695, %v788_v1 }
 0xa1b   :  { %v876_v4 = vpop.xlane.xlu0 %875 }
 0xa1c   :  { %1132 = vpow2.f32 %v791_v3  ;;  %v880_v5 = vsub.f32 %v872_v57, %v876_v4 }
 0xa1d   :  { %1134 = vpow2.f32 %v884_v2 }
 0xa1e   :  { %v882_v6 = vmul.f32 1.442695, %v880_v5 }
 0xa1f   :  { %v899_v7 = vpop.permute.xlu0 %898 }
 0xa20   :  { %1136 = vpow2.f32 %v882_v6  ;;  %1057 = vmatpush3.bf16.msra.mxu0 %v899_v7 }
 0xa22   :  { %v1131_v8 = vpop.eup %1130 }
 0xa23   :  { %v793_v10 = vsel %vm41_vm7, %v1131_v8, 0.0 }
 0xa24   :  { %v795_v11 = vsel %vm58_vm1, %v793_v10, 0.0 }
 0xa25   :  { %796 = vadd.xlane.f32.xlu0 %v795_v11 }
 0xa26   :  { %v1133_v12 = vpop.eup %1132 }
 0xa27   :  { %v794_v13 = vsel %vm42_vm6, %v1133_v12, 0.0  ;;  %v1135_v14 = vpop.eup %1134 }
 0xa28   :  { %v798_v15 = vsel %vm58_vm1, %v794_v13, 0.0  ;;  %v803_v16 = vpack.c.bf16 %v794_v13, %v793_v10  ;;  %v887_v21 = vsel %vm42_vm6, %v1135_v14, 0.0 }
 0xa29   :  { %799 = vadd.xlane.f32.xlu1 %v798_v15  ;;  %v891_v24 = vsel %vm58_vm1, %v887_v21, 0.0 }
 0xa2a   :  { %v1137_v19 = vpop.eup %1136  ;;  %1053 = vmatmul.mubr.msk.bf16.vlgmr.msra.gmra.mrb[12].mxu1 %vm58_vm1, %v803_v16 }
 0xa2b   :  { %v886_v20 = vsel %vm41_vm7, %v1137_v19, 0.0 }
 0xa2c   :  { %v888_v22 = vsel %vm58_vm1, %v886_v20, 0.0  ;;  %v896_v23 = vpack.c.bf16 %v887_v21, %v886_v20 }
 0xa2d   :  { %889 = vadd.xlane.f32.xlu1 %v888_v22 }
 0xa2e   :  { %1059 = vmatmul.mubr.msk.bf16.vlgmr.msra.gmra.mrb[16].mxu0 %vm58_vm1, %v896_v23  ;;  %vm953_vm1 = vcmask 64512  }
 0xa31   :  { %892 = vadd.xlane.f32.xlu1 %v891_v24 }
 0xab2   :  { %v797_v27 = vpop.xlane.xlu0 %796 }
 0xab3   :  { %v801_v28 = vmax.f32 %v797_v27, 1e-30 }
 0xab5   :  { %1138 = vrcp.f32 %v801_v28 }
 0xab6   :  { %v800_v25 = vpop.xlane.xlu1 %799 }
 0xab7   :  { %v802_v50 = vmax.f32 %v800_v25, 1e-30 }
 0xaba   :  { %v890_v26 = vpop.xlane.xlu1 %889 }
 0xabb   :  { %v894_v30 = vmax.f32 %v890_v26, 1e-30 }
 0xabd   :  { %1140 = vrcp.f32 %v894_v30 }
 0xabe   :  { %v893_v29 = vpop.xlane.xlu1 %892  ;;  %1142 = vrcp.f32 %v802_v50 }
 0xabf   :  { %v895_v31 = vmax.f32 %v893_v29, 1e-30  ;;  %v1139_v49 = vpop.eup %1138 }
 0xac0   :  { %v849_v37 = vmul.f32 0.5, %v1139_v49 }
 0xac1   :  { %1144 = vrcp.f32 %v895_v31 }
 0xac7   :  { %v1141_v32 = vpop.eup %1140 }
 0xac8   :  { %v1143_v34 = vpop.eup %1142  ;;  %v946_v39 = vmul.f32 0.5, %v1141_v32 }
 0xac9   :  { %v851_v42 = vmul.f32 0.5, %v1143_v34 }
 0xacb   :  { %v1145_v0 = vpop.eup %1144 }
 0xacc   :  { %v948_v45 = vmul.f32 0.5, %v1145_v0 }
 0xafd   :  { %v841_v33 = vpop.f32.mrb[12].mxu1 }
 0xafe   :  { %v1054_v35 = vpop.f32.mrb[13].mxu1  ;;  %v852_v41 = vmul.f32 %v849_v37, %v841_v33 }
 0xaff   :  { %v844_v36 = vpop.f32.mrb[14].mxu1 }
 0xb00   :  { %v1055_v38 = vpop.f32.mrb[15].mxu1  ;;  %v853_v47 = vmul.f32 %v851_v42, %v844_v36 }
 0xb01   :  { %v938_v40 = vpop.f32.mrb[16].mxu0 }
 0xb02   :  { %v949_v43 = vmul.f32 %v946_v39, %v938_v40  ;;  %v1060_v44 = vpop.f32.mrb[17].mxu0 }
 0xb03   :  { %v941_v46 = vpop.f32.mrb[18].mxu0 }
 0xb04   :  { %v951_v48 = vadd.f32 %v949_v43, %v852_v41  ;;  %v950_v51 = vmul.f32 %v948_v45, %v941_v46  ;;  %v1061_v52 = vpop.f32.mrb[19].mxu0 }
 0xb06   :  { %954 = vst.msk [vmem:[%s1374_s5] sm:$0xff] %vm953_vm1, %v951_v48  ;;  %v952_v53 = vadd.f32 %v950_v51, %v853_v47 }
 0xb08   :  { %955 = vst.msk [vmem:[%s1374_s5 + $0x8] sm:$0xff] %vm953_vm1, %v952_v53 }
 0xb09   :  { %960 = vsyncpa [#allocation3], 1 }

</bundles_post_ra>
